<compile_context>
chip_gen: v7x
topology: tpu7x:2x2x1
jax: 0.10.0
libtpu: 0.0.40
codegen_flags: <defaults>
</compile_context>

<pallas_src>
import functools

import jax
import jax.numpy as jnp
from jax import lax
from jax.experimental import pallas as pl
from jax.experimental.pallas import tpu as pltpu


_LANES = 128
_TARGET_BLOCK_BYTES = 2 * 1024 * 1024   # per input, per grid step (native dtype)
_VMEM_LIMIT_BYTES = 32 * 1024 * 1024    # 2 in x 2 buf x 2 MiB + f32 temps << 32 MiB


def _pow(x, gamma):
    """x ** gamma with cheap special cases for static integer gamma."""
    g = float(gamma)
    if g == 2.0:
        return x * x                      # pure VPU, no EUP exp/log
    if g > 0 and g == float(int(g)):
        return lax.integer_pow(x, int(g))
    return x ** g


def _l0_partial_sums_kernel(pred_ref, tgt_ref, out_ref, *, gamma, eps,
                            block_rows, valid_rows, blocks_per_core,
                            n_full_blocks, needs_mask):
    """Per-core partial sums of (|pred - tgt| + eps) ** gamma.

    Grid: (n_cores [parallel], blocks_per_core [arbitrary]).
    out_ref is the core's resident (1, 8, 128) f32 accumulator block.
    """
    step = pl.program_id(1)

    @pl.when(step == 0)
    def _():
        out_ref[...] = jnp.zeros_like(out_ref)

    p = pred_ref[...].astype(jnp.float32)
    t = tgt_ref[...].astype(jnp.float32)
    loss = _pow(jnp.abs(p - t) + eps, gamma)

    def fold(x):
        # (block_rows, 128) -> (8, 128): pure vector adds, no cross-lane work.
        return jnp.sum(x.reshape(block_rows // 8, 8, _LANES), axis=0)

    if not needs_mask:
        # Evenly-dividing case: no mask code is traced at all.
        out_ref[...] += fold(loss)[None]
    else:
        logical_block = pl.program_id(0) * blocks_per_core + step
        is_interior = logical_block < n_full_blocks

        @pl.when(is_interior)
        def _():
            # Steady-state path: unmasked accumulate.
            out_ref[...] += fold(loss)[None]

        @pl.when(jnp.logical_not(is_interior))
        def _():
            # Edge path only: partial last block and/or the clamped
            # out-of-range duplicate block of an odd block count.
            row = (logical_block * block_rows
                   + lax.broadcasted_iota(jnp.int32, loss.shape, 0))
            out_ref[...] += fold(jnp.where(row < valid_rows, loss, 0.0))[None]


def l0_loss(pred, target, gamma=2.0, eps=1e-8,
            block_bytes=_TARGET_BLOCK_BYTES):
    """Pallas TPU implementation of L0Loss.forward."""
    assert pred.shape == target.shape, "pred/target must have identical shapes"
    n_total = pred.size
    gamma = float(gamma)
    eps = float(eps)

    # Sublane granularity per dtype: f32 -> 8, bf16/f16 -> 16, int8/fp8 -> 32.
    itemsize = int(jnp.dtype(pred.dtype).itemsize)
    sublane = max(8, 32 // max(itemsize, 1))

    # Constant-byte blocks: same DMA size per step regardless of input dtype.
    target_rows = (int(block_bytes) // (itemsize * _LANES)) // sublane * sublane
    target_rows = max(sublane, target_rows)

    # Main region: everything up to a multiple of 128 elements (lane width).
    n_main = (n_total // _LANES) * _LANES
    rows_main = n_main // _LANES
    if rows_main < sublane:           # tiny input: do everything in plain JAX
        n_main, rows_main = 0, 0

    p_flat = pred.reshape(-1)
    t_flat = target.reshape(-1)

    total = jnp.float32(0.0)

    if rows_main > 0:
        block_rows = min(target_rows, (rows_main // sublane) * sublane)
        n_blocks_total = pl.cdiv(rows_main, block_rows)

        # Split block range across (up to) 2 TensorCores (v7x); the leading
        # "parallel" axis is a no-op serial loop on single-TC chips.
        n_cores = 2 if n_blocks_total >= 2 else 1
        blocks_per_core = pl.cdiv(n_blocks_total, n_cores)

        n_full_blocks = rows_main // block_rows
        needs_mask = (n_full_blocks != n_blocks_total) or \
                     (n_cores * blocks_per_core != n_blocks_total)

        # Only slice when n_total is not a multiple of 128 (rare); otherwise
        # the 2-D view is a free reshape of the full array (no HBM copy).
        if n_main == n_total:
            p2 = p_flat.reshape(rows_main, _LANES)
            t2 = t_flat.reshape(rows_main, _LANES)
        else:
            p2 = p_flat[:n_main].reshape(rows_main, _LANES)
            t2 = t_flat[:n_main].reshape(rows_main, _LANES)

        if n_cores * blocks_per_core == n_blocks_total:
            def in_map(c, i):
                return (c * blocks_per_core + i, 0)
        else:
            # Odd block count: core 1's final logical block is out of range;
            # clamp the DMA index (safe) and let the in-kernel mask zero it.
            def in_map(c, i):
                return (jnp.minimum(c * blocks_per_core + i,
                                    n_blocks_total - 1), 0)

        kernel = functools.partial(
            _l0_partial_sums_kernel, gamma=gamma, eps=eps,
            block_rows=block_rows, valid_rows=rows_main,
            blocks_per_core=blocks_per_core, n_full_blocks=n_full_blocks,
            needs_mask=needs_mask)

        partials = pl.pallas_call(
            kernel,
            out_shape=jax.ShapeDtypeStruct((n_cores, 8, _LANES), jnp.float32),
            grid_spec=pltpu.PrefetchScalarGridSpec(
                num_scalar_prefetch=0,
                grid=(n_cores, blocks_per_core),
                in_specs=[
                    pl.BlockSpec((block_rows, _LANES), in_map),
                    pl.BlockSpec((block_rows, _LANES), in_map),
                ],
                out_specs=pl.BlockSpec((1, 8, _LANES), lambda c, i: (c, 0, 0)),
            ),
            compiler_params=pltpu.CompilerParams(
                dimension_semantics=("parallel", "arbitrary"),
                vmem_limit_bytes=_VMEM_LIMIT_BYTES),
        )(p2, t2)

        total = total + jnp.sum(partials, dtype=jnp.float32)

    # Tail smaller than one 128-lane row: plain JAX (negligible work).
    if n_main < n_total:
        pt = p_flat[n_main:].astype(jnp.float32)
        tt = t_flat[n_main:].astype(jnp.float32)
        total = total + jnp.sum(_pow(jnp.abs(pt - tt) + eps, gamma))

    return total / jnp.float32(n_total)


def _reference(pred, target, gamma=2.0, eps=1e-8):
    return jnp.mean((jnp.abs(pred.astype(jnp.float32)
                             - target.astype(jnp.float32)) + eps) ** gamma)


if __name__ == "__main__":
    key = jax.random.PRNGKey(0)
    keys = jax.random.split(key, 10)

    # 1) Small NCHW input (typical image-restoration use).
    pred = jax.random.normal(keys[0], (2, 4, 16, 16), dtype=jnp.float32)
    target = jax.random.normal(keys[1], (2, 4, 16, 16), dtype=jnp.float32)
    out = jax.block_until_ready(l0_loss(pred, target, gamma=2.0, eps=1e-8))
    ref = _reference(pred, target, gamma=2.0, eps=1e-8)
    assert jnp.allclose(out, ref, rtol=1e-5, atol=1e-6), (out, ref)

    # 2) Larger input with a small block override: exercises the multi-block
    #    grid, the 2-way "parallel" core split, and the clamped+masked
    #    out-of-range duplicate block (25 blocks over 2 cores).
    pred2 = jax.random.normal(keys[2], (2, 8, 160, 160), dtype=jnp.float32)
    target2 = pred2 + 0.1 * jax.random.normal(keys[3], (2, 8, 160, 160),
                                              dtype=jnp.float32)
    ref2 = _reference(pred2, target2)
    out2 = jax.block_until_ready(l0_loss(pred2, target2,
                                         block_bytes=64 * 1024))
    assert jnp.allclose(out2, ref2, rtol=1e-4, atol=1e-7), (out2, ref2)

    # 2b) Same input with default (2 MiB) blocks: single block, single core.
    out2b = jax.block_until_ready(l0_loss(pred2, target2))
    assert jnp.allclose(out2b, ref2, rtol=1e-4, atol=1e-7), (out2b, ref2)

    # 3) Odd size: exercises partial-row-block masking + plain-JAX tail.
    pred3 = jax.random.normal(keys[4], (2, 3, 17, 13), dtype=jnp.float32)
    target3 = jax.random.normal(keys[5], (2, 3, 17, 13), dtype=jnp.float32)
    out3 = jax.block_until_ready(l0_loss(pred3, target3))
    ref3 = _reference(pred3, target3)
    assert jnp.allclose(out3, ref3, rtol=1e-5, atol=1e-6), (out3, ref3)

    # 4) Rows not a multiple of sublane + tail, partial block on core 1.
    pred4 = jax.random.normal(keys[6], (1, 1, 100, 36), dtype=jnp.float32)
    target4 = jax.random.normal(keys[7], (1, 1, 100, 36), dtype=jnp.float32)
    out4 = jax.block_until_ready(l0_loss(pred4, target4,
                                         block_bytes=12 * 1024))
    ref4 = _reference(pred4, target4)
    assert jnp.allclose(out4, ref4, rtol=1e-5, atol=1e-6), (out4, ref4)

    # 5) bf16 inputs: constant-byte blocking + in-kernel f32 upcast.
    pred5 = jax.random.normal(keys[8], (2, 4, 32, 32), dtype=jnp.bfloat16)
    target5 = jax.random.normal(keys[9], (2, 4, 32, 32), dtype=jnp.bfloat16)
    out5 = jax.block_until_ready(l0_loss(pred5, target5))
    ref5 = _reference(pred5, target5)
    assert jnp.allclose(out5, ref5, rtol=1e-4, atol=1e-6), (out5, ref5)

    print("KERNEL_OK")
</pallas_src>

<mosaic_0001>
module attributes {stable_mosaic.version = 11 : i64} {
  func.func @_l0_partial_sums_kernel(%arg0: i32, %arg1: i32, %arg2: memref<16x128xf32, #tpu.memory_space<vmem>>, %arg3: memref<16x128xf32, #tpu.memory_space<vmem>>, %arg4: memref<1x8x128xf32, #tpu.memory_space<vmem>>) attributes {dimension_semantics = [#tpu.dimension_semantics<parallel>, #tpu.dimension_semantics<arbitrary>], iteration_bounds = array<i64: 1, 1>, scalar_prefetch = 0 : i64, scratch_operands = 0 : i64, tpu.core_type = #tpu.core_type<tc>, window_params = [{transform_indices = @transform_0, window_bounds = array<i64: 16, 128>}, {transform_indices = @transform_1, window_bounds = array<i64: 16, 128>}, {transform_indices = @transform_2, window_bounds = array<i64: 1, 8, 128>}]} {
    %c0_i32 = arith.constant 0 : i32
    %0 = arith.cmpi eq, %arg1, %c0_i32 : i32
    %1 = arith.extui %0 : i1 to i32
    %c0_i32_0 = arith.constant 0 : i32
    %2 = arith.cmpi ne, %1, %c0_i32_0 : i32
    scf.if %2 {
      %cst_11 = arith.constant 0.000000e+00 : f32
      %16 = vector.broadcast %cst_11 : f32 to vector<1x8x128xf32>
      %c0_12 = arith.constant 0 : index
      %c0_13 = arith.constant 0 : index
      %c0_14 = arith.constant 0 : index
      %17 = vector.load %arg4[%c0_12, %c0_13, %c0_14] : memref<1x8x128xf32, #tpu.memory_space<vmem>>, vector<1x8x128xf32>
      tpu.vector_store %arg4[%c0_12, %c0_13, %c0_14], %16 {strides = array<i32>} : memref<1x8x128xf32, #tpu.memory_space<vmem>>, vector<1x8x128xf32>,
    } else {
    }
    %c0 = arith.constant 0 : index
    %c0_1 = arith.constant 0 : index
    %3 = vector.load %arg2[%c0, %c0_1] : memref<16x128xf32, #tpu.memory_space<vmem>>, vector<16x128xf32>
    %c0_2 = arith.constant 0 : index
    %c0_3 = arith.constant 0 : index
    %4 = vector.load %arg3[%c0_2, %c0_3] : memref<16x128xf32, #tpu.memory_space<vmem>>, vector<16x128xf32>
    %5 = arith.subf %3, %4 : vector<16x128xf32>
    %6 = math.absf %5 : vector<16x128xf32>
    %cst = arith.constant 9.99999993E-9 : f32
    %7 = vector.broadcast %cst : f32 to vector<16x128xf32>
    %8 = arith.addf %6, %7 : vector<16x128xf32>
    %9 = arith.mulf %8, %8 : vector<16x128xf32>
    %c0_4 = arith.constant 0 : index
    %c0_5 = arith.constant 0 : index
    %c0_6 = arith.constant 0 : index
    %10 = vector.load %arg4[%c0_4, %c0_5, %c0_6] : memref<1x8x128xf32, #tpu.memory_space<vmem>>, vector<1x8x128xf32>
    %11 = vector.shape_cast %9 : vector<16x128xf32> to vector<2x8x128xf32>
    %cst_7 = arith.constant dense<0.000000e+00> : vector<8x128xf32>
    %12 = vector.multi_reduction <add>, %11, %cst_7 [0] : vector<2x8x128xf32> to vector<8x128xf32>
    %13 = vector.shape_cast %12 : vector<8x128xf32> to vector<1x8x128xf32>
    %14 = arith.addf %10, %13 : vector<1x8x128xf32>
    %c0_8 = arith.constant 0 : index
    %c0_9 = arith.constant 0 : index
    %c0_10 = arith.constant 0 : index
    %15 = vector.load %arg4[%c0_8, %c0_9, %c0_10] : memref<1x8x128xf32, #tpu.memory_space<vmem>>, vector<1x8x128xf32>
    tpu.vector_store %arg4[%c0_8, %c0_9, %c0_10], %14 {strides = array<i32>} : memref<1x8x128xf32, #tpu.memory_space<vmem>>, vector<1x8x128xf32>,
    return
  }
  func.func @transform_0(%arg0: i32, %arg1: i32) -> (i32, i32) {
    %c1_i32 = arith.constant 1 : i32
    %0 = arith.muli %arg0, %c1_i32 : i32
    %1 = arith.addi %0, %arg1 : i32
    %c0_i32 = arith.constant 0 : i32
    %c0_i32_0 = arith.constant 0 : i32
    return %1, %c0_i32 : i32, i32
  }
  func.func @transform_1(%arg0: i32, %arg1: i32) -> (i32, i32) {
    %c1_i32 = arith.constant 1 : i32
    %0 = arith.muli %arg0, %c1_i32 : i32
    %1 = arith.addi %0, %arg1 : i32
    %c0_i32 = arith.constant 0 : i32
    %c0_i32_0 = arith.constant 0 : i32
    return %1, %c0_i32 : i32, i32
  }
  func.func @transform_2(%arg0: i32, %arg1: i32) -> (i32, i32, i32) {
    %c0_i32 = arith.constant 0 : i32
    %c0_i32_0 = arith.constant 0 : i32
    %c0_i32_1 = arith.constant 0 : i32
    return %arg0, %c0_i32, %c0_i32_0 : i32, i32, i32
  }
}

</mosaic_0001>

<bundles_post_ra>
// kernel: tpu_custom_call.1
= control target key start
LH: loop header
LB: loop body
LE: loop exit
PB: predicated region body
PF: predicated region fallthrough
CT: control target
= control target key end

     0   :  { %7 = vsyncpa [#allocation3], 0  ;;  %s223_s0 = inlined_call_operand.hbm [shape: f32[16,128], index: 0, kind: input, shape index: {}]   ;;  %s224_s1 = inlined_call_operand.hbm [shape: f32[16,128], index: 1, kind: input, shape index: {}]   ;;  %s225_s2 = inlined_call_operand.hbm [shape: f32[1,8,128], index: 2, kind: output, shape index: {}]  }
   0x1   :  { %8 = vsyncpa [#allocation6], 0 }
   0x2   :  { %9 = vsyncpa [#allocation4], 0  ;;  %s167_s9 = smov [#allocation2]   ;;  %s95_s13 = scalar_lea.hbm %s223_s0, 256 }
   0x3   :  { %s19_s10 = sshll.u32 %s167_s9, 4  ;;  %p96_p0 = scmp.ne.s32.totalorder %s223_s0, %s95_s13  ;;  %s20_s10 = int_to_ptr.vmem [resolvable:$true] %s19_s10 }
   0x4   :  { %p99_p1 = scmp.lt.u32.totalorder %s95_s13, %s223_s0 }
   0x6   :  { %p101_p2 = pnand %p99_p1, %p96_p0 }
   0x8   :  { %104 = shalt.err (!%p101_p2)
}
   0x9   :  { %s105_s18 = scalar_lea.vmem %s20_s10, 256  ;;  %p110_p4 = scmp.lt.s32.totalorder %s20_s10, %s20_s10 }
   0xa   :  { %p106_p3 = scmp.ne.s32.totalorder %s20_s10, %s105_s18  ;;  %p111_p5 = scmp.lt.s32.totalorder %s105_s18, %s105_s18 }
   0xc   :  { %p112_p6 = por %p111_p5, %p110_p4 }
   0xe   :  { %p113_p7 = pnand %p112_p6, %p106_p3 }
  0x10   :  { %116 = shalt.err (!%p113_p7)
}
  0x11   :  { %s168_s19 = smov 128   ;;  %s169_s20 = smov 8  }
  0x12   :  { %25 = dma.hbm_to_vmem [thread:$0]  %s223_s0, 256, %s20_s10, [#allocation3], %s168_s19, %s168_s19, %s169_s20  }
  0x13   :  { %s170_s23 = smov [#allocation5]   ;;  %s117_s27 = scalar_lea.hbm %s224_s1, 256 }
  0x14   :  { %s35_s24 = sshll.u32 %s170_s23, 4  ;;  %p118_p8 = scmp.ne.s32.totalorder %s224_s1, %s117_s27  ;;  %s36_s24 = int_to_ptr.vmem [resolvable:$true] %s35_s24 }
  0x15   :  { %p121_p9 = scmp.lt.u32.totalorder %s117_s27, %s224_s1 }
  0x17   :  { %p123_p10 = pnand %p121_p9, %p118_p8 }
  0x19   :  { %126 = shalt.err (!%p123_p10)
}
  0x1a   :  { %s127_s4 = scalar_lea.vmem %s36_s24, 256  ;;  %p132_p12 = scmp.lt.s32.totalorder %s36_s24, %s36_s24 }
  0x1b   :  { %p128_p11 = scmp.ne.s32.totalorder %s36_s24, %s127_s4  ;;  %p133_p13 = scmp.lt.s32.totalorder %s127_s4, %s127_s4 }
  0x1d   :  { %p134_p0 = por %p133_p13, %p132_p12 }
  0x1f   :  { %p135_p1 = pnand %p134_p0, %p128_p11 }
  0x21   :  { %138 = shalt.err (!%p135_p1)
}
  0x22   :  { %41 = dma.hbm_to_vmem [thread:$0]  %s224_s1, 256, %s36_s24, [#allocation6], %s168_s19, %s168_s19, %s169_s20  }
  0x23   :  { %161 = dma.done.wait [#allocation3], 256  }
  0x24   :  { %162 = vsyncadd [#allocation3], 4294967040 }
  0x25   :  { %163 = dma.done.wait [#allocation6], 256  }
  0x26   :  { %164 = vsyncadd [#allocation6], 4294967040  ;;  %v57_v0 = vld [vmem:[#allocation2] sm:$0xff]  ;;  %v58_v1 = vld [vmem:[#allocation2 + $0x8] sm:$0xff]  ;;  %s171_s6 = smov [#allocation7]  }
  0x27   :  { %v59_v2 = vld [vmem:[#allocation5] sm:$0xff]  ;;  %v60_v3 = vld [vmem:[#allocation5 + $0x8] sm:$0xff]  ;;  %s79_s7 = sshll.u32 %s171_s6, 4  ;;  %s80_s7 = int_to_ptr.vmem [resolvable:$true] %s79_s7 }
  0x28   :  { %v61_v4 = vsub.f32 %v57_v0, %v59_v2  ;;  %v62_v5 = vsub.f32 %v58_v1, %v60_v3  ;;  %s139_s1 = scalar_lea.vmem %s80_s7, 128  ;;  %p144_p3 = scmp.lt.s32.totalorder %s80_s7, %s80_s7 }
  0x29   :  { %p140_p2 = scmp.ne.s32.totalorder %s80_s7, %s139_s1  ;;  %p145_p4 = scmp.lt.s32.totalorder %s139_s1, %s139_s1 }
  0x2a   :  { %v63_v6 = vand.u32 2147483647, %v61_v4  ;;  %v64_v7 = vand.u32 2147483647, %v62_v5 }
  0x2b   :  { %p146_p5 = por %p145_p4, %p144_p3 }
  0x2c   :  { %v65_v8 = vadd.f32 1e-08, %v63_v6  ;;  %v66_v9 = vadd.f32 1e-08, %v64_v7 }
  0x2d   :  { %p147_p6 = pnand %p146_p5, %p140_p2 }
  0x2e   :  { %v67_v10 = vmul.f32 %v65_v8, %v65_v8  ;;  %v68_v11 = vmul.f32 %v66_v9, %v66_v9 }
  0x30   :  { %v70_v12 = vadd.f32 %v68_v11, %v67_v10 }
  0x32   :  { %72 = vst [vmem:[#allocation7] sm:$0xff] %v70_v12 }
  0x33   :  { %150 = shalt.err (!%p147_p6)
}
  0x34   :  { %s151_s10 = scalar_lea.hbm %s225_s2, 128 }
  0x35   :  { %p152_p7 = scmp.ne.s32.totalorder %s225_s2, %s151_s10  ;;  %p155_p8 = scmp.lt.u32.totalorder %s151_s10, %s225_s2 }
  0x37   :  { %p157_p9 = pnand %p155_p8, %p152_p7 }
  0x39   :  { %160 = shalt.err (!%p157_p9)
}
  0x3a   :  { %82 = dma.vmem_to_hbm [thread:$0]  %s80_s7, 128, %s225_s2, [#allocation4]  }
  0x3b   :  { %165 = dma.done.wait [#allocation4], 128  }
  0x3c   :  { %166 = vsyncadd [#allocation4], 4294967168 }
  0x3d   :  { %86 = vsyncpa [#allocation3], 1 }
  0x3e   :  { %87 = vsyncpa [#allocation6], 1 }
  0x3f   :  { %88 = vsyncpa [#allocation4], 1 }

</bundles_post_ra>
